<compile_context>
chip_gen: v7x
topology: tpu7x:2x2x1
jax: 0.10.0
libtpu: 0.0.40
codegen_flags: <defaults>
</compile_context>

<pallas_src>
import functools

import jax
import jax.numpy as jnp
from jax import lax
from jax.experimental import pallas as pl
from jax.experimental.pallas import tpu as pltpu


def _dropout_logits_kernel(seed_ref, x_ref, o_ref, *,
                           keep_threshold, epsilon, block_rows, n_cols):
    """One grid step = one (block_rows, N) row-slab of the logits."""
    i = pl.program_id(0)
    tm, tn = x_ref.shape

    # Global element index (row * N + col) -> randomness is independent of the
    # chosen tiling and deterministic w.r.t. the user seed.
    row_off = (i * block_rows).astype(jnp.uint32)
    rows = lax.broadcasted_iota(jnp.uint32, (tm, tn), 0) + row_off
    cols = lax.broadcasted_iota(jnp.uint32, (tm, tn), 1)
    idx = rows * jnp.uint32(n_cols) + cols

    # Counter-based hash: mix the seed in, then murmur3 fmix32 finalizer.
    # All 32-bit integer VPU ops; no TPU-specific PRNG primitives needed.
    seed_u32 = seed_ref[0].astype(jnp.uint32)
    h = idx ^ (seed_u32 * jnp.uint32(0x9E3779B9))
    h = h ^ (h >> 16)
    h = h * jnp.uint32(0x85EBCA6B)
    h = h ^ (h >> 13)
    h = h * jnp.uint32(0xC2B2AE35)
    h = h ^ (h >> 16)

    # P(keep) = keep_threshold / 2^32 = 1 - p  (bias <= 2^-32, negligible).
    keep = h < jnp.uint32(keep_threshold)

    x = x_ref[...]
    o_ref[...] = jnp.where(keep, x, jnp.full_like(x, epsilon))


def _sublane_multiple(dtype) -> int:
    # Keep blocks at native vreg packing: 8 rows for 4-byte, 16 for 2-byte,
    # 32 for 1-byte dtypes.
    itemsize = jnp.dtype(dtype).itemsize
    return {4: 8, 2: 16, 1: 32}.get(itemsize, 8)


def dropout_logits(logits, seed, *, p=0.5, epsilon=-1e9, training=True,
                   block_rows=None, vmem_budget_bytes=2 * 1024 * 1024):
    """Pallas equivalent of DropoutLogits.forward.

    Works for any-rank input; leading dims are flattened so the last (hidden)
    dim maps to TPU lanes.  NOTE: epsilon=-1e9 overflows to -inf for float16
    logits; f32/bf16 are the supported dtypes.
    """
    if not training or p == 0.0:
        return logits

    orig_shape = logits.shape
    N = orig_shape[-1]
    x2 = logits.reshape(-1, N)
    M = x2.shape[0]

    keep_prob = 1.0 - float(p)
    keep_threshold = min(int(keep_prob * (2 ** 32)), 2 ** 32 - 1)

    itemsize = jnp.dtype(logits.dtype).itemsize
    sub = _sublane_multiple(logits.dtype)
    if block_rows is None:
        # Target ~2 MiB per buffer: big enough to sit on the HBM-roofline
        # plateau, small enough for v5e's 16 MiB scoped VMEM and v7x's 64 MiB
        # physical VMEM with double-buffered in+out.
        cand = vmem_budget_bytes // max(N * itemsize, 1)
        if cand >= M:
            block_rows = M                       # whole array in one block
        else:
            block_rows = max((cand // sub) * sub, sub)
    else:
        block_rows = min(block_rows, M)

    kernel = functools.partial(
        _dropout_logits_kernel,
        keep_threshold=keep_threshold,
        epsilon=epsilon,
        block_rows=block_rows,
        n_cols=N,
    )

    seed_arr = jnp.asarray([seed], dtype=jnp.int32)
    grid = (pl.cdiv(M, block_rows),)

    out2 = pl.pallas_call(
        kernel,
        out_shape=jax.ShapeDtypeStruct((M, N), logits.dtype),
        grid_spec=pltpu.PrefetchScalarGridSpec(
            num_scalar_prefetch=1,               # seed lands in SMEM
            grid=grid,
            in_specs=[pl.BlockSpec((block_rows, N), lambda i, seed: (i, 0))],
            out_specs=pl.BlockSpec((block_rows, N), lambda i, seed: (i, 0)),
        ),
        compiler_params=pltpu.CompilerParams(
            dimension_semantics=("parallel",)),
        cost_estimate=pl.CostEstimate(
            flops=M * N, transcendentals=0,
            bytes_accessed=2 * M * N * itemsize),
    )(seed_arr, x2)

    return out2.reshape(orig_shape)


if __name__ == "__main__":
    key = jax.random.PRNGKey(0)
    # Small logits tensor: (batch*seq, hidden) = (16, 256).
    logits = jax.random.normal(key, (16, 256), dtype=jnp.float32)

    p = 0.5
    epsilon = -1e9
    out = dropout_logits(logits, seed=1234, p=p, epsilon=epsilon, training=True)
    out = jax.block_until_ready(out)

    # Sanity checks: every output element is either the original logit (kept)
    # or exactly epsilon (dropped), and the drop rate is roughly p.
    kept = out == logits
    dropped = out == jnp.float32(epsilon)
    assert bool(jnp.all(kept | dropped)), \
        "output has values that are neither kept nor epsilon"
    drop_frac = float(jnp.mean(dropped.astype(jnp.float32)))
    assert 0.3 < drop_frac < 0.7, f"drop fraction {drop_frac} far from p={p}"

    # Eval mode is identity.
    out_eval = dropout_logits(logits, seed=1234, p=p, epsilon=epsilon,
                              training=False)
    assert bool(jnp.all(out_eval == logits))

    print("KERNEL_OK")
</pallas_src>

<mosaic_0001>
module attributes {stable_mosaic.version = 11 : i64} {
  func.func @_dropout_logits_kernel(%arg0: i32, %arg1: memref<1xi32, #tpu.memory_space<smem>>, %arg2: memref<16x256xf32, #tpu.memory_space<vmem>>, %arg3: memref<16x256xf32, #tpu.memory_space<vmem>>) attributes {dimension_semantics = [#tpu.dimension_semantics<parallel>], iteration_bounds = array<i64: 1>, scalar_prefetch = 1 : i64, scratch_operands = 0 : i64, tpu.core_type = #tpu.core_type<tc>, window_params = [{transform_indices = @transform_0, window_bounds = array<i64: 16, 256>}, {transform_indices = @transform_1, window_bounds = array<i64: 16, 256>}]} {
    %c16_i32 = arith.constant 16 : i32
    %0 = arith.muli %arg0, %c16_i32 : i32
    %1 = tpu.iota {dimensions = array<i32: 0>} : vector<16x256xi32>
    %2 = vector.broadcast %0 : i32 to vector<16x256xi32>
    %3 = arith.addi %1, %2 : vector<16x256xi32>
    %4 = tpu.iota {dimensions = array<i32: 1>} : vector<16x256xi32>
    %c256_i32 = arith.constant 256 : i32
    %5 = vector.broadcast %c256_i32 : i32 to vector<16x256xi32>
    %6 = arith.muli %3, %5 : vector<16x256xi32>
    %7 = arith.addi %6, %4 : vector<16x256xi32>
    %c0 = arith.constant 0 : index
    %8 = memref.load %arg1[%c0] : memref<1xi32, #tpu.memory_space<smem>>
    %c-1640531527_i32 = arith.constant -1640531527 : i32
    %9 = arith.muli %8, %c-1640531527_i32 : i32
    %10 = vector.broadcast %9 : i32 to vector<16x256xi32>
    %11 = arith.xori %7, %10 : vector<16x256xi32>
    %c16_i32_0 = arith.constant 16 : i32
    %12 = vector.broadcast %c16_i32_0 : i32 to vector<16x256xi32>
    %13 = arith.shrui %11, %12 : vector<16x256xi32>
    %14 = arith.xori %11, %13 : vector<16x256xi32>
    %c-2048144789_i32 = arith.constant -2048144789 : i32
    %15 = vector.broadcast %c-2048144789_i32 : i32 to vector<16x256xi32>
    %16 = arith.muli %14, %15 : vector<16x256xi32>
    %c13_i32 = arith.constant 13 : i32
    %17 = vector.broadcast %c13_i32 : i32 to vector<16x256xi32>
    %18 = arith.shrui %16, %17 : vector<16x256xi32>
    %19 = arith.xori %16, %18 : vector<16x256xi32>
    %c-1028477387_i32 = arith.constant -1028477387 : i32
    %20 = vector.broadcast %c-1028477387_i32 : i32 to vector<16x256xi32>
    %21 = arith.muli %19, %20 : vector<16x256xi32>
    %c16_i32_1 = arith.constant 16 : i32
    %22 = vector.broadcast %c16_i32_1 : i32 to vector<16x256xi32>
    %23 = arith.shrui %21, %22 : vector<16x256xi32>
    %24 = arith.xori %21, %23 : vector<16x256xi32>
    %c-2147483648_i32 = arith.constant -2147483648 : i32
    %25 = vector.broadcast %c-2147483648_i32 : i32 to vector<16x256xi32>
    %26 = arith.cmpi ult, %24, %25 : vector<16x256xi32>
    %c0_2 = arith.constant 0 : index
    %c0_3 = arith.constant 0 : index
    %27 = vector.load %arg2[%c0_2, %c0_3] : memref<16x256xf32, #tpu.memory_space<vmem>>, vector<16x256xf32>
    %cst = arith.constant -1.000000e+09 : f32
    %28 = vector.broadcast %cst : f32 to vector<16x256xf32>
    %29 = arith.select %26, %27, %28 : vector<16x256xi1>, vector<16x256xf32>
    %c0_4 = arith.constant 0 : index
    %c0_5 = arith.constant 0 : index
    %30 = vector.load %arg3[%c0_4, %c0_5] : memref<16x256xf32, #tpu.memory_space<vmem>>, vector<16x256xf32>
    tpu.vector_store %arg3[%c0_4, %c0_5], %29 {strides = array<i32>} : memref<16x256xf32, #tpu.memory_space<vmem>>, vector<16x256xf32>,
    return
  }
  func.func @transform_0(%arg0: i32, %arg1: memref<1xi32, #tpu.memory_space<smem>>) -> (i32, i32) {
    %c0_i32 = arith.constant 0 : i32
    %c0_i32_0 = arith.constant 0 : i32
    return %arg0, %c0_i32 : i32, i32
  }
  func.func @transform_1(%arg0: i32, %arg1: memref<1xi32, #tpu.memory_space<smem>>) -> (i32, i32) {
    %c0_i32 = arith.constant 0 : i32
    %c0_i32_0 = arith.constant 0 : i32
    return %arg0, %c0_i32 : i32, i32
  }
}

</mosaic_0001>

<bundles_post_ra>
// kernel: tpu_custom_call.1
= control target key start
LH: loop header
LB: loop body
LE: loop exit
PB: predicated region body
PF: predicated region fallthrough
CT: control target
= control target key end

     0   :  { %8 = vsyncpa [#allocation5], 0  ;;  %s217_s0 = inlined_call_operand.<no memory space> [shape: s32[1], index: 0, kind: input, shape index: {}]   ;;  %s218_s1 = inlined_call_operand.hbm [shape: f32[16,256], index: 1, kind: input, shape index: {}]   ;;  %s219_s2 = inlined_call_operand.hbm [shape: f32[16,256], index: 2, kind: output, shape index: {}]  }
   0x1   :  { %9 = vsyncpa [#allocation6], 0  ;;  %s165_s9 = smov [#allocation4]   ;;  %s117_s13 = scalar_lea.hbm %s218_s1, 512 }
   0x2   :  { %s15_s10 = sshll.u32 %s165_s9, 4  ;;  %p118_p0 = scmp.ne.s32.totalorder %s218_s1, %s117_s13  ;;  %s16_s10 = int_to_ptr.vmem [resolvable:$true] %s15_s10 }
   0x3   :  { %p121_p1 = scmp.lt.u32.totalorder %s117_s13, %s218_s1 }
   0x5   :  { %p123_p2 = pnand %p121_p1, %p118_p0 }
   0x7   :  { %126 = shalt.err (!%p123_p2)
}
   0x8   :  { %s127_s18 = scalar_lea.vmem %s16_s10, 512  ;;  %p132_p4 = scmp.lt.s32.totalorder %s16_s10, %s16_s10 }
   0x9   :  { %p128_p3 = scmp.ne.s32.totalorder %s16_s10, %s127_s18  ;;  %p133_p5 = scmp.lt.s32.totalorder %s127_s18, %s127_s18 }
   0xb   :  { %p134_p6 = por %p133_p5, %p132_p4 }
   0xd   :  { %p135_p7 = pnand %p134_p6, %p128_p3 }
   0xf   :  { %138 = shalt.err (!%p135_p7)
}
  0x10   :  { %s166_s19 = smov 256   ;;  %s167_s20 = smov 16  }
  0x11   :  { %21 = dma.hbm_to_vmem [thread:$0]  %s218_s1, 512, %s16_s10, [#allocation5], %s166_s19, %s166_s19, %s167_s20  }
  0x12   :  { %161 = dma.done.wait [#allocation5], 512  }
  0x13   :  { %162 = vsyncadd [#allocation5], 4294966784  ;;  %v26_v0 = vlaneseq  ;;  %s42_s25 = smul.u32 2654435769, %s217_s0  ;;  %v84_v43 = vld [vmem:[#allocation4] sm:$0xff]  ;;  %v85_v45 = vld [vmem:[#allocation4 + $0x8] sm:$0xff] }
  0x14   :  { %s168_s0 = smov [#allocation7]   ;;  %v86_v49 = vld [vmem:[#allocation4 + $0x10] sm:$0xff]  ;;  %v87_v51 = vld [vmem:[#allocation4 + $0x18] sm:$0xff] }
  0x15   :  { %v27_v1 = vshrl.u32 %v26_v0, 7  ;;  %v33_v2 = vand.u32 127, %v26_v0  ;;  %v43_v6 = vstv %s42_s25  ;;  %s101_s1 = sshll.u32 %s168_s0, 4  ;;  %s102_s1 = int_to_ptr.vmem [resolvable:$true] %s101_s1 }
  0x16   :  { %s139_s26 = scalar_lea.vmem %s102_s1, 512  ;;  %p144_p9 = scmp.lt.s32.totalorder %s102_s1, %s102_s1 }
  0x17   :  { %v35_v3 = vmul.u32 256, %v27_v1  ;;  %v34_v4 = vadd.s32 128, %v33_v2  ;;  %v28_v5 = vadd.s32 8, %v27_v1  ;;  %p140_p8 = scmp.ne.s32.totalorder %s102_s1, %s139_s26  ;;  %p145_p10 = scmp.lt.s32.totalorder %s139_s26, %s139_s26 }
  0x19   :  { %v37_v7 = vadd.s32 %v35_v3, %v33_v2  ;;  %v38_v8 = vadd.s32 %v35_v3, %v34_v4  ;;  %v36_v9 = vmul.u32 256, %v28_v5  ;;  %p146_p11 = por %p145_p10, %p144_p9 }
  0x1b   :  { %v44_v10 = vxor.u32 %v43_v6, %v37_v7  ;;  %v45_v11 = vxor.u32 %v43_v6, %v38_v8  ;;  %v39_v12 = vadd.s32 %v36_v9, %v33_v2  ;;  %v40_v13 = vadd.s32 %v36_v9, %v34_v4  ;;  %p147_p12 = pnand %p146_p11, %p140_p8 }
  0x1d   :  { %v48_v14 = vshrl.u32 %v44_v10, 16  ;;  %v49_v15 = vshrl.u32 %v45_v11, 16  ;;  %v46_v16 = vxor.u32 %v43_v6, %v39_v12  ;;  %v47_v17 = vxor.u32 %v43_v6, %v40_v13 }
  0x1f   :  { %v52_v18 = vxor.u32 %v48_v14, %v44_v10  ;;  %v53_v19 = vxor.u32 %v49_v15, %v45_v11  ;;  %v50_v20 = vshrl.u32 %v46_v16, 16  ;;  %v51_v21 = vshrl.u32 %v47_v17, 16 }
  0x21   :  { %v56_v22 = vmul.u32 2246822507, %v52_v18  ;;  %v57_v23 = vmul.u32 2246822507, %v53_v19  ;;  %v54_v24 = vxor.u32 %v50_v20, %v46_v16  ;;  %v55_v25 = vxor.u32 %v51_v21, %v47_v17 }
  0x23   :  { %v60_v26 = vshrl.u32 %v56_v22, 13  ;;  %v61_v27 = vshrl.u32 %v57_v23, 13  ;;  %v58_v28 = vmul.u32 2246822507, %v54_v24  ;;  %v59_v29 = vmul.u32 2246822507, %v55_v25 }
  0x25   :  { %v64_v30 = vxor.u32 %v60_v26, %v56_v22  ;;  %v65_v31 = vxor.u32 %v61_v27, %v57_v23  ;;  %v62_v32 = vshrl.u32 %v58_v28, 13  ;;  %v63_v33 = vshrl.u32 %v59_v29, 13 }
  0x27   :  { %v68_v34 = vmul.u32 3266489909, %v64_v30  ;;  %v69_v35 = vmul.u32 3266489909, %v65_v31  ;;  %v66_v36 = vxor.u32 %v62_v32, %v58_v28  ;;  %v67_v37 = vxor.u32 %v63_v33, %v59_v29 }
  0x29   :  { %v72_v38 = vshrl.u32 %v68_v34, 16  ;;  %v73_v39 = vshrl.u32 %v69_v35, 16  ;;  %v70_v40 = vmul.u32 3266489909, %v66_v36  ;;  %v71_v41 = vmul.u32 3266489909, %v67_v37 }
  0x2b   :  { %v76_v42 = vxor.u32 %v72_v38, %v68_v34  ;;  %v77_v44 = vxor.u32 %v73_v39, %v69_v35  ;;  %v74_v46 = vshrl.u32 %v70_v40, 16  ;;  %v75_v47 = vshrl.u32 %v71_v41, 16 }
  0x2d   :  { %vm80_vm0 = vcmp.lt.u32.totalorder %v76_v42, 2147483648  ;;  %vm81_vm1 = vcmp.lt.u32.totalorder %v77_v44, 2147483648  ;;  %v78_v48 = vxor.u32 %v74_v46, %v70_v40  ;;  %v79_v50 = vxor.u32 %v75_v47, %v71_v41 }
  0x2e   :  { %v88_v52 = vsel %vm80_vm0, %v84_v43, -1e+09  ;;  %v89_v53 = vsel %vm81_vm1, %v85_v45, -1e+09 }
  0x2f   :  { %92 = vst [vmem:[#allocation7] sm:$0xff] %v88_v52  ;;  %93 = vst [vmem:[#allocation7 + $0x8] sm:$0xff] %v89_v53  ;;  %vm82_vm2 = vcmp.lt.u32.totalorder %v78_v48, 2147483648  ;;  %vm83_vm3 = vcmp.lt.u32.totalorder %v79_v50, 2147483648 }
  0x30   :  { %v90_v54 = vsel %vm82_vm2, %v86_v49, -1e+09  ;;  %v91_v55 = vsel %vm83_vm3, %v87_v51, -1e+09 }
  0x31   :  { %94 = vst [vmem:[#allocation7 + $0x10] sm:$0xff] %v90_v54  ;;  %95 = vst [vmem:[#allocation7 + $0x18] sm:$0xff] %v91_v55 }
  0x32   :  { %150 = shalt.err (!%p147_p12)
}
  0x33   :  { %s151_s29 = scalar_lea.hbm %s219_s2, 512 }
  0x34   :  { %p152_p13 = scmp.ne.s32.totalorder %s219_s2, %s151_s29  ;;  %p155_p0 = scmp.lt.u32.totalorder %s151_s29, %s219_s2 }
  0x36   :  { %p157_p1 = pnand %p155_p0, %p152_p13 }
  0x38   :  { %160 = shalt.err (!%p157_p1)
}
  0x39   :  { %107 = dma.vmem_to_hbm [thread:$0]  %s102_s1, 512, %s219_s2, [#allocation6], %s166_s19, %s166_s19, %s167_s20  }
  0x3a   :  { %163 = dma.done.wait [#allocation6], 512  }
  0x3b   :  { %164 = vsyncadd [#allocation6], 4294966784 }
  0x3c   :  { %111 = vsyncpa [#allocation5], 1 }
  0x3d   :  { %112 = vsyncpa [#allocation6], 1 }

</bundles_post_ra>
